<compile_context>
chip_gen: v7x
topology: tpu7x:2x2x1
jax: 0.10.0
libtpu: 0.0.40
codegen_flags: <defaults>
</compile_context>

<pallas_src>
import functools

import jax
import jax.numpy as jnp
from jax import lax
from jax.experimental import pallas as pl
from jax.experimental.pallas import tpu as pltpu


# ----------------------------- Pallas kernel ------------------------------ #
def _score_kernel(a_ref, c_ref, e_ref, out_ref):
    # a_ref:   (B, D)       bf16 folded query activations (grid-invariant, resident)
    # c_ref:   (B, 1)       f32  folded per-row bias      (grid-invariant, resident)
    # e_ref:   (TILE_N, D)  bf16 slab of the raw entity embedding table (streamed)
    # out_ref: (B, TILE_N)  f32  probabilities for this entity slab
    #
    # a @ E^T : contract on the last (D, lane) axis of both operands — no
    # per-tile transpose, lane-dense (B, tile_n) output stores.
    s = lax.dot_general(
        a_ref[...], e_ref[...],
        dimension_numbers=(((1,), (1,)), ((), ())),
        preferred_element_type=jnp.float32)           # MXU bf16 x bf16 -> f32 acc
    out_ref[...] = jax.nn.sigmoid(s + c_ref[...]).astype(out_ref.dtype)


# ------------------------------- Helpers ----------------------------------- #
def _round_up(x, m):
    return (x + m - 1) // m * m


def _bn_scale_shift(gamma, beta, mean, var, eps=1e-5):
    """Eval-mode BatchNorm1d as y = x*scale + shift."""
    scale = gamma * lax.rsqrt(var + eps)
    shift = beta - mean * scale
    return scale, shift


def _pick_tile_n(num_entities, itemsize):
    """Entity-axis tile: as large as the default scoped VMEM allows, but at
    least two grid steps whenever the table permits (v7x megacore)."""
    n128 = _round_up(num_entities, 128)
    # ceil(N/2) rounded up to a lane-dense multiple of 128
    half = max(128, _round_up((n128 + 1) // 2, 128))
    # ~4 MiB slab per buffer at D=128: 16384 rows in bf16, 8192 rows in f32.
    max_tile = 16384 if itemsize <= 2 else 8192
    return int(min(max_tile, half))


def _fold_query(e1, rel, params):
    """Batch-side (grid-invariant) folded query: a (B, D) f32, c (B, 1) f32."""
    emb_e, emb_rel = params["emb_e"], params["emb_rel"]
    w_ent, w_rel = params["w_ent"], params["w_rel"]        # (L, D) like torch Linear

    s0, b0 = _bn_scale_shift(*params["bn0"])
    s1, b1 = _bn_scale_shift(*params["bn1"])
    s2, b2 = _bn_scale_shift(*params["bn2"])

    # gather + bn0  (inp_drop / hidden_drop are identity at inference time)
    e1_emb = emb_e[e1] * s0 + b0                 # (B, D)
    rel_emb = emb_rel[rel] * s0 + b0             # (B, D)
    e1_dec = (e1_emb @ w_ent.T) * s1 + b1        # ent_decompress + bn1  (B, L)
    rel_dec = (rel_emb @ w_rel.T) * s2 + b2      # rel_decompress + bn2  (B, L)
    q = e1_dec * rel_dec                         # (B, L)

    # fold the entity-side affine chain through the score matmul
    m = (s0[:, None] * w_ent.T) * s1[None, :]    # (D, L)
    d = (b0 @ w_ent.T) * s1 + b1                 # (L,)
    a = q @ m.T                                  # (B, D)  folded query
    c = (q @ d)[:, None]                         # (B, 1)  folded bias
    return a, c


# ------------------------------ Host wrapper ------------------------------- #
@functools.partial(jax.jit, static_argnames=("tile_n",))
def ldecom_distmult_forward(e1, rel, params, tile_n=None):
    """LDecomDistMult scoring of (e1, rel) against all entities.

    e1, rel : int32 index vectors of shape (B,)  (== the PyTorch (B,1) squeezed)
    params  : dict with embedding tables (incl. precomputed bf16 streaming copy
              'emb_e_bf16'), decompression weights, BN stats
    returns : (B, num_entities) float32 probabilities in (0, 1)
    """
    emb_stream = params["emb_e_bf16"]            # (N, D) bf16, prepared at init
    N, D = emb_stream.shape
    B = e1.shape[0]

    a, c = _fold_query(e1, rel, params)          # tiny, plain-JAX glue
    a = a.astype(jnp.bfloat16)                   # stream the query in bf16 too

    if tile_n is None:
        tile_n = _pick_tile_n(N, emb_stream.dtype.itemsize)
    tile_n = max(128, _round_up(tile_n, 128))    # lane-dense output stores

    grid = (pl.cdiv(N, tile_n),)                 # ragged last block masked by Pallas
    out = pl.pallas_call(
        _score_kernel,
        out_shape=jax.ShapeDtypeStruct((B, N), jnp.float32),
        grid_spec=pltpu.PrefetchScalarGridSpec(
            num_scalar_prefetch=0,
            grid=grid,
            in_specs=[
                pl.BlockSpec((B, D), lambda j: (0, 0)),        # a: resident
                pl.BlockSpec((B, 1), lambda j: (0, 0)),        # c: resident
                pl.BlockSpec((tile_n, D), lambda j: (j, 0)),   # entity slab (streamed)
            ],
            out_specs=pl.BlockSpec((B, tile_n), lambda j: (0, j)),
        ),
        compiler_params=pltpu.CompilerParams(
            dimension_semantics=("parallel",)),
    )(a, c, emb_stream)
    return out


# ------------------------- Deterministic parameters ------------------------ #
def init_params(key, num_entities, num_relations, embedding_dim, lde_size=400):
    """xavier_normal_ init; entity/relation row 0 zeroed (padding_idx=0).

    Also precomputes the bf16 streaming copy of the entity table ONCE here
    (outside the jitted forward), so no per-call cast/pad of the (N, D) table.
    BatchNorm stats are non-trivial so the affine folding is actually exercised.
    """
    ks = jax.random.split(key, 7)

    def xavier_normal(k, shape):
        fan_out, fan_in = shape
        std = (2.0 / (fan_in + fan_out)) ** 0.5
        return std * jax.random.normal(k, shape, dtype=jnp.float32)

    emb_e = xavier_normal(ks[0], (num_entities, embedding_dim)).at[0].set(0.0)
    emb_rel = xavier_normal(ks[1], (num_relations, embedding_dim)).at[0].set(0.0)
    w_ent = xavier_normal(ks[2], (lde_size, embedding_dim))
    w_rel = xavier_normal(ks[3], (lde_size, embedding_dim))

    def bn_params(k, dim):
        k1, k2, k3, k4 = jax.random.split(k, 4)
        gamma = 1.0 + 0.1 * jax.random.normal(k1, (dim,), jnp.float32)
        beta = 0.1 * jax.random.normal(k2, (dim,), jnp.float32)
        mean = 0.1 * jax.random.normal(k3, (dim,), jnp.float32)
        var = jax.random.uniform(k4, (dim,), jnp.float32, minval=0.5, maxval=1.5)
        return gamma, beta, mean, var

    return dict(
        emb_e=emb_e,
        emb_e_bf16=emb_e.astype(jnp.bfloat16),   # streaming copy, built once
        emb_rel=emb_rel, w_ent=w_ent, w_rel=w_rel,
        bn0=bn_params(ks[4], embedding_dim),
        bn1=bn_params(ks[5], lde_size),
        bn2=bn_params(ks[6], lde_size),
    )


# --------------------------- Pure-JAX references ---------------------------- #
def reference_forward(e1, rel, params, eps=1e-5):
    """Direct, unfolded transcription of the PyTorch forward (eval mode, f32)."""
    def bn(x, p):
        gamma, beta, mean, var = p
        return (x - mean) / jnp.sqrt(var + eps) * gamma + beta

    emb_e, emb_rel = params["emb_e"], params["emb_rel"]
    w_ent, w_rel = params["w_ent"], params["w_rel"]
    e1_emb = bn(emb_e[e1], params["bn0"])
    rel_emb = bn(emb_rel[rel], params["bn0"])
    e1_dec = bn(e1_emb @ w_ent.T, params["bn1"])
    rel_dec = bn(rel_emb @ w_rel.T, params["bn2"])
    e2_dec = bn(bn(emb_e, params["bn0"]) @ w_ent.T, params["bn1"])
    return jax.nn.sigmoid((e1_dec * rel_dec) @ e2_dec.T)


def reference_forward_bf16_stream(e1, rel, params):
    """Same folded math as the kernel path, with bf16-rounded streamed operands
    but f32 accumulation — tight reference for what the kernel computes."""
    a, c = _fold_query(e1, rel, params)
    a_q = a.astype(jnp.bfloat16).astype(jnp.float32)
    e_q = params["emb_e_bf16"].astype(jnp.float32)
    s = jnp.dot(a_q, e_q.T, precision=lax.Precision.HIGHEST)
    return jax.nn.sigmoid(s + c)


# ---------------------------------- Main ----------------------------------- #
if __name__ == "__main__":
    NUM_ENTITIES = 300      # deliberately NOT a multiple of 128: exercises the
                            # ragged last block (no per-call padding of the table)
    NUM_RELATIONS = 32
    EMBEDDING_DIM = 128     # Config.embedding_dim
    BATCH = 8

    key = jax.random.PRNGKey(0)
    kparams, ke1, krel = jax.random.split(key, 3)

    params = init_params(kparams, NUM_ENTITIES, NUM_RELATIONS, EMBEDDING_DIM)
    e1 = jax.random.randint(ke1, (BATCH,), 0, NUM_ENTITIES, dtype=jnp.int32)
    rel = jax.random.randint(krel, (BATCH,), 0, NUM_RELATIONS, dtype=jnp.int32)

    pred = ldecom_distmult_forward(e1, rel, params)
    pred = jax.block_until_ready(pred)
    assert pred.shape == (BATCH, NUM_ENTITIES)
    assert bool(jnp.all(jnp.isfinite(pred)))

    # Tight check: kernel vs. the same math with bf16-rounded streamed operands.
    ref_q = reference_forward_bf16_stream(e1, rel, params)
    err_q = float(jnp.max(jnp.abs(pred - ref_q)))
    assert jnp.allclose(pred, ref_q, atol=1e-3, rtol=1e-3), f"bf16-ref err {err_q}"

    # Sanity check: kernel vs. the exact f32 PyTorch transcription (loose
    # tolerance covers the bf16 table quantization + matmul re-association).
    ref = reference_forward(e1, rel, params)
    err = float(jnp.max(jnp.abs(pred - ref)))
    assert jnp.allclose(pred, ref, atol=1e-2, rtol=1e-2), f"f32-ref err {err}"

    print("KERNEL_OK")
</pallas_src>

<mosaic_0001>
module attributes {stable_mosaic.version = 11 : i64} {
  func.func @_score_kernel(%arg0: i32, %arg1: memref<8x128xbf16, #tpu.memory_space<vmem>>, %arg2: memref<8x1xf32, #tpu.memory_space<vmem>>, %arg3: memref<256x128xbf16, #tpu.memory_space<vmem>>, %arg4: memref<8x256xf32, #tpu.memory_space<vmem>>) attributes {dimension_semantics = [#tpu.dimension_semantics<parallel>], iteration_bounds = array<i64: 2>, scalar_prefetch = 0 : i64, scratch_operands = 0 : i64, tpu.core_type = #tpu.core_type<tc>, window_params = [{pipeline_mode = #tpu.pipeline_mode<synchronous>, transform_indices = @transform_0, window_bounds = array<i64: 8, 128>}, {pipeline_mode = #tpu.pipeline_mode<synchronous>, transform_indices = @transform_1, window_bounds = array<i64: 8, 1>}, {transform_indices = @transform_2, window_bounds = array<i64: 256, 128>}, {transform_indices = @transform_3, window_bounds = array<i64: 8, 256>}]} {
    %c0 = arith.constant 0 : index
    %c0_0 = arith.constant 0 : index
    %0 = vector.load %arg1[%c0, %c0_0] : memref<8x128xbf16, #tpu.memory_space<vmem>>, vector<8x128xbf16>
    %c0_1 = arith.constant 0 : index
    %c0_2 = arith.constant 0 : index
    %1 = vector.load %arg3[%c0_1, %c0_2] : memref<256x128xbf16, #tpu.memory_space<vmem>>, vector<256x128xbf16>
    %cst = arith.constant dense<0.000000e+00> : vector<8x256xf32>
    %2 = tpu.matmul %0, %1, %cst {dimension_numbers = #tpu.dot_dimension_numbers<[1], [1], [0], [0], [0, 0, 1, 0], [], []>} : vector<8x128xbf16>, vector<256x128xbf16>, vector<8x256xf32> -> vector<8x256xf32>
    %c0_3 = arith.constant 0 : index
    %c0_4 = arith.constant 0 : index
    %3 = vector.load %arg2[%c0_3, %c0_4] : memref<8x1xf32, #tpu.memory_space<vmem>>, vector<8x1xf32>
    %4 = vector.broadcast %3 : vector<8x1xf32> to vector<8x256xf32>
    %5 = arith.addf %2, %4 : vector<8x256xf32>
    %6 = arith.negf %5 : vector<8x256xf32>
    %7 = math.exp %6 : vector<8x256xf32>
    %cst_5 = arith.constant 1.000000e+00 : f32
    %8 = vector.broadcast %cst_5 : f32 to vector<8x256xf32>
    %9 = arith.addf %8, %7 : vector<8x256xf32>
    %10 = arith.divf %8, %9 : vector<8x256xf32>
    %c0_6 = arith.constant 0 : index
    %c0_7 = arith.constant 0 : index
    %11 = vector.load %arg4[%c0_6, %c0_7] : memref<8x256xf32, #tpu.memory_space<vmem>>, vector<8x256xf32>
    tpu.vector_store %arg4[%c0_6, %c0_7], %10 {strides = array<i32>} : memref<8x256xf32, #tpu.memory_space<vmem>>, vector<8x256xf32>,
    return
  }
  func.func @transform_0(%arg0: i32) -> (i32, i32) {
    %c0_i32 = arith.constant 0 : i32
    %c0_i32_0 = arith.constant 0 : i32
    %c0_i32_1 = arith.constant 0 : i32
    return %c0_i32, %c0_i32_0 : i32, i32
  }
  func.func @transform_1(%arg0: i32) -> (i32, i32) {
    %c0_i32 = arith.constant 0 : i32
    %c0_i32_0 = arith.constant 0 : i32
    %c0_i32_1 = arith.constant 0 : i32
    return %c0_i32, %c0_i32_0 : i32, i32
  }
  func.func @transform_2(%arg0: i32) -> (i32, i32) {
    %c0_i32 = arith.constant 0 : i32
    %c0_i32_0 = arith.constant 0 : i32
    return %arg0, %c0_i32 : i32, i32
  }
  func.func @transform_3(%arg0: i32) -> (i32, i32) {
    %c0_i32 = arith.constant 0 : i32
    %c0_i32_0 = arith.constant 0 : i32
    return %c0_i32, %arg0 : i32, i32
  }
}

</mosaic_0001>

<bundles_post_ra>
// kernel: ldecom_distmult_forward.1
= control target key start
LH: loop header
LB: loop body
LE: loop exit
PB: predicated region body
PF: predicated region fallthrough
CT: control target
= control target key end

     0   :  { %8 = vsyncpa [#allocation3], 0  ;;  %s801_s0 = inlined_call_operand.vmem [shape: bf16[8,128], index: 0, kind: input, shape index: {}]   ;;  %s802_s1 = inlined_call_operand.vmem [shape: f32[8,1], index: 1, kind: input, shape index: {}]   ;;  %s803_s2 = inlined_call_operand.vmem [shape: bf16[300,128], index: 2, kind: input, shape index: {}]   ;;  %s804_s3 = inlined_call_operand.hbm [shape: f32[8,300], index: 3, kind: output, shape index: {}]  }
   0x1   :  { %10 = vsyncpa [#allocation3 + $0x1], 0  ;;  %s670_s12 = smov 0   ;;  %s672_s13 = smov 0  }
   0x2   :  { %s674_s14 = smov 0   ;;  %s676_s15 = smov 0  }
   0x3 LB: > { %s691_s16 = sadd.s32 4294967295, %s646_s15   ;;  %s467_s17 = sadd.s32 4294967294, %s646_s15   ;;  %s646_s15 = sphi %s676_s15, %s810_s15   ;;  %s642_s14 = sphi %s674_s14, %s809_s14   ;;  %s638_s13 = sphi %s672_s13, %s808_s13   ;;  %s634_s12 = sphi %s670_s12, %s807_s12  }
   0x4   : > { %s695_s18 = sadd.s32 1, %s646_s15   ;;  %s91_s19 = sadd.s32 1, %s642_s14 }
   0x5   : > { %s88_s20 = ssub.s32 %s646_s15, %s695_s18  ;;  %p101_p0 = scmp.ne.s32.totalorder %s642_s14, %s638_s13 }
   0x6   : > { %p89_p1 = scmp.eq.s32.totalorder %s88_s20, 0  ;;  %p102_p2 = scmp.eq.s32.totalorder %s691_s16, 1 }
   0x7   : > { %p107_p3 = scmp.ne.s32.totalorder %s638_s13, %s634_s12  ;;  %p108_p4 = scmp.eq.s32.totalorder %s467_s17, 1 }
   0x8   : > { %s706_s21 = scalar_select %p89_p1, %s642_s14, %s91_s19  }
   0x9   : > { %p708_p5 = por %p102_p2, %p101_p0  ;;  %p712_p6 = por %p108_p4, %p107_p3 }
   0xa   : > { %p470_p7 = scmp.ge.s32.totalorder %s646_s15, 1  ;;  %p149_p8 = scmp.lt.s32.totalorder %s646_s15, 3 }
   0xc   : > { %p150_p9 = pnand %p470_p7, %p149_p8 }
   0xd   : > { %s472_s24 = sshll.u32 (!%p150_p9), %s691_s16, 5  ;;  %v197_v0 = vld [vmem:[%s801_s0] sm:$0xf] (!%p150_p9)  ;;  %v648_v2 = vmov (!%p150_p9), 0   ;;  %s174_s6 = sand.u32 (!%p150_p9), 1, %s638_s13  }
   0xe   : > { %153 = sbr.rel (%p150_p9) target bundleno = 358 (0x166), region = 32  ;;  %v230_v1 = vld [vmem:[%s802_s1] sm:$0xff] (!%p150_p9)  ;;  %p182_p10 = scmp.lt.s32.totalorder (!%p150_p9), %s472_s24, 37  ;;  %518 = vmatprep.mubr.bf16.mxu0 (!%p150_p9), %v197_v0  ;;  %559 = vset.pattern.permute.xlu0 (!%p150_p9), %v648_v2 }
   0xf   : > { %233 = vperm.xlu0 (!%p150_p9), %559, %v230_v1   ;;  %s471_s7 = sshll.u32 (!%p150_p9), %s174_s6, 4  ;;  %s747_s9 = scalar_lea.sflag (!%p150_p9), [#allocation3], %s174_s6 }
  0x10   : > { %s176_s8 = scalar_lea.vmem (!%p150_p9), [#allocation2], %s471_s7 }
  0x15   : > { %s812_s24 = smov (!%p182_p10, %s472_s24), 37  ;;  %s493_s10 = sshll.u32 (%p708_p5), %s691_s16, 1 }
  0x16   : > { %s473_s29 = sshll.u32 %s812_s24, 2  ;;  %s396_s11 = ssub.s32 (%p708_p5), 3, %s493_s10 }
  0x17   : > { %s728_s5 = scalar_lea.vmem %s803_s2, %s473_s29  ;;  %p397_p11 = scmp.lt.s32.totalorder (%p708_p5), %s396_s11, 2 }
  0x18   : > { %v560_v3 = vld [vmem:[%s728_s5 + $0x40] sm:$0xff]   ;;  %v562_v5 = vld [vmem:[%s728_s5 + $0x48] sm:$0xff]   ;;  %v564_v7 = vld [vmem:[%s728_s5 + $0x50] sm:$0xff]  }
  0x19   : > { %v561_v4 = vld [vmem:[%s728_s5] sm:$0xff]   ;;  %502 = vmatprep.subr.bf16.mxu0 %v560_v3  ;;  %v563_v6 = vld [vmem:[%s728_s5 + $0x8] sm:$0xff]   ;;  %v565_v8 = vld [vmem:[%s728_s5 + $0x10] sm:$0xff]  }
  0x1a   : > { %503 = vmatpush3.bf16.xpose.msra.mxu0 %v561_v4  ;;  %v566_v9 = vld [vmem:[%s728_s5 + $0x58] sm:$0xff]   ;;  %v568_v11 = vld [vmem:[%s728_s5 + $0x60] sm:$0xff]   ;;  %v570_v13 = vld [vmem:[%s728_s5 + $0x68] sm:$0xff]  }
  0x1b   : > { %504 = vmatprep.subr.bf16.mxu0 %v562_v5  ;;  %v567_v10 = vld [vmem:[%s728_s5 + $0x18] sm:$0xff]   ;;  %v569_v12 = vld [vmem:[%s728_s5 + $0x20] sm:$0xff]   ;;  %v571_v14 = vld [vmem:[%s728_s5 + $0x28] sm:$0xff]  }
  0x1c   : > { %v572_v15 = vld [vmem:[%s728_s5 + $0x70] sm:$0xff]   ;;  %v574_v17 = vld [vmem:[%s728_s5 + $0x78] sm:$0xff]  }
  0x1d   : > { %v573_v16 = vld [vmem:[%s728_s5 + $0x30] sm:$0xff]   ;;  %v575_v18 = vld [vmem:[%s728_s5 + $0x38] sm:$0xff]  }
  0x22   : > { %505 = vmatpush3.bf16.xpose.msra.mxu0 %v563_v6 }
  0x23   : > { %506 = vmatprep.subr.bf16.mxu0 %v564_v7 }
  0x2a   : > { %507 = vmatpush3.bf16.xpose.msra.mxu0 %v565_v8 }
  0x2b   : > { %508 = vmatprep.subr.bf16.mxu0 %v566_v9 }
  0x32   : > { %509 = vmatpush3.bf16.xpose.msra.mxu0 %v567_v10 }
  0x33   : > { %510 = vmatprep.subr.bf16.mxu0 %v568_v11 }
  0x3a   : > { %511 = vmatpush3.bf16.xpose.msra.mxu0 %v569_v12 }
  0x3b   : > { %512 = vmatprep.subr.bf16.mxu0 %v570_v13 }
  0x42   : > { %513 = vmatpush3.bf16.xpose.msra.mxu0 %v571_v14 }
  0x43   : > { %514 = vmatprep.subr.bf16.mxu0 %v572_v15 }
  0x4a   : > { %515 = vmatpush3.bf16.xpose.msra.mxu0 %v573_v16 }
  0x4b   : > { %516 = vmatprep.subr.bf16.mxu0 %v574_v17 }
  0x52   : > { %517 = vmatpush3.bf16.xpose.msra.mxu0 %v575_v18 }
  0x59   : > { %519 = vmatmul.mubr.bf16.vlgmr.msra.gmra.mrb[0].mxu0 %v197_v0 }
  0x8e   : > { %v234_v19 = vpop.permute.xlu0 %233 }
 0x12c   : > { %v366_v20 = vpop.f32.mrb[0].mxu0 }
 0x12d   : > { %v367_v21 = vadd.f32 %v366_v20, %v234_v19  ;;  %v368_v22 = vpop.f32.mrb[1].mxu0 }
 0x12e   : > { %v369_v23 = vadd.f32 %v368_v22, %v234_v19  ;;  %v370_v24 = vpop.f32.mrb[2].mxu0 }
 0x12f   : > { %v490_v25 = vmul.f32 -1.442695, %v367_v21  ;;  %v371_v26 = vpop.f32.mrb[3].mxu0 }
 0x130   : > { %v491_v27 = vmul.f32 -1.442695, %v369_v23 }
 0x131   : > { %576 = vpow2.f32 %v490_v25 }
 0x132   : > { %578 = vpow2.f32 %v491_v27 }
 0x13b   : > { %v577_v28 = vpop.eup %576 }
 0x13c   : > { %v579_v29 = vpop.eup %578  ;;  %v379_v30 = vadd.f32 1.0, %v577_v28 }
 0x13d   : > { %v380_v31 = vadd.f32 1.0, %v579_v29 }
 0x13e   : > { %580 = vrcp.f32 %v379_v30 }
 0x13f   : > { %582 = vrcp.f32 %v380_v31 }
 0x144   : > { %394 = sbr.rel (!%p708_p5) target bundleno = 358 (0x166), region = 36 }
 0x148   : > { %v581_v32 = vpop.eup %580 }
 0x149   : > { %v583_v33 = vpop.eup %582  ;;  %385 = vst [vmem:[%s176_s8] sm:$0xff] %v581_v32 }
 0x14a   : > { %386 = vst [vmem:[%s176_s8 + $0x8] sm:$0xff] %v583_v33 }
 0x14b   : > { %s814_s11 = smov (!%p397_p11, %s396_s11), 2 }
 0x14c   : > { %s752_s17 = sshll.u32 %s814_s11, 7 }
 0x14d   : > { %s401_s19 = ssub.s32 256, %s752_s17 }
 0x14e   : > { %402 = vsyncadd %s747_s9, %s401_s19  ;;  %p495_p12 = scmp.ne.s32.totalorder %s752_s17, 0  ;;  %s501_s20 = sshll.u32 %s691_s16, 8 }
 0x14f   : > { %s761_s25 = scalar_lea.hbm %s804_s3, %s501_s20  ;;  %s408_s26 = sshll.u32 %s176_s8, 4  ;;  %s409_s26 = int_to_ptr.vmem [resolvable:$true] %s408_s26 }
 0x150   : > { %s584_s27 = scalar_lea.vmem %s409_s26, %s752_s17  ;;  %s649_s28 = smov [#allocation2]  }
 0x151   : > { %p585_p13 = scmp.ne.s32.totalorder %s409_s26, %s584_s27  ;;  %s588_s29 = sshll.u32 %s649_s28, 4  ;;  %s589_s29 = int_to_ptr.vmem [resolvable:$false] %s588_s29 }
 0x152   : > { %s590_s30 = scalar_lea.vmem %s589_s29, 512  ;;  %p591_p2 = scmp.lt.s32.totalorder %s409_s26, %s589_s29 }
 0x153   : > { %p586_p0 = pnand %p585_p13, %p495_p12  ;;  %p592_p3 = scmp.lt.s32.totalorder %s590_s30, %s584_s27 }
 0x155   : > { %p587_p1 = pneg %p586_p0  ;;  %p593_p4 = por %p592_p3, %p591_p2 }
 0x157   : > { %p594_p5 = pnand %p593_p4, %p587_p1 }
 0x159   : > { %597 = shalt.err (!%p594_p5)
}
 0x15a   : > { %s598_s16 = scalar_lea.hbm %s761_s25, %s752_s17  ;;  %s602_s6 = scalar_lea.hbm %s804_s3, 384 }
 0x15b   : > { %p599_p7 = scmp.ne.s32.totalorder %s761_s25, %s598_s16  ;;  %p603_p10 = scmp.lt.u32.totalorder %s761_s25, %s804_s3 }
 0x15c   : > { %p604_p11 = scmp.lt.u32.totalorder %s602_s6, %s598_s16  ;;  %p606_p0 = scmp.lt.u32.totalorder %s598_s16, %s761_s25 }
 0x15d   : > { %p600_p8 = pnand %p599_p7, %p495_p12 }
 0x15e   : > { %p605_p13 = por %p604_p11, %p603_p10 }
 0x15f   : > { %p601_p9 = pneg %p600_p8 }
 0x160   : > { %p607_p1 = por %p606_p0, %p605_p13 }
 0x162   : > { %p608_p2 = pnand %p607_p1, %p601_p9 }
 0x164   : > { %611 = shalt.err (!%p608_p2)
}
 0x165   : > { %411 = dma.vmem_to_hbm [thread:$0]  (%p495_p12), %s409_s26, %s752_s17, %s761_s25, %s747_s9  }
 0x166 PF: > { %p525_p3 = scmp.ge.s32.totalorder %s646_s15, 2  ;;  %s420_s10 = sand.u32 1, %s634_s12  }
 0x167   : > { %s421_s11 = scalar_lea.sflag [#allocation3], %s420_s10 }
 0x168   : > { %p522_p4 = pnand %p525_p3, %p712_p6 }
 0x16a   : > { %629 = dma.done.wait (!%p522_p4), %s421_s11, 256  }
 0x16b   : > { %631 = vsyncadd (!%p522_p4), %s421_s11, 4294967040  ;;  %p13_p5 = scmp.ge.s32.totalorder %s695_s18, 4   ;;  %s807_s12 = smov %s638_s13 }
 0x16c   : > { %s808_s13 = smov %s642_s14  ;;  %s809_s14 = smov %s706_s21 }
 0x16d   : > { %s810_s15 = smov %s695_s18  ;;  %15 = sbr.rel (!%p13_p5) target bundleno = 3 (0x3), region = 67 }
 0x174   :  { %426 = vsyncpa [#allocation3], 1 }
 0x175   :  { %428 = vsyncpa [#allocation3 + $0x1], 1 }

</bundles_post_ra>
